<compile_context>
chip_gen: v7x
topology: tpu7x:2x2x1
jax: 0.10.0
libtpu: 0.0.40
codegen_flags: <defaults>
</compile_context>

<pallas_src>
import jax
import jax.numpy as jnp
from jax.experimental import pallas as pl
from jax.experimental.pallas import tpu as pltpu


# ----------------------------------------------------------------------------
# Fused kernel: T GRU steps, embedding lookup in-kernel, weights VMEM-resident,
# hidden state carried in VMEM scratch across grid iterations.
# ----------------------------------------------------------------------------
def gru_seq_kernel(tok_ref,      # SMEM (T, B) int32   (scalar prefetch)
                   emb_ref,      # VMEM (V, E)   f32   resident
                   h0_ref,       # VMEM (B, H)   f32   resident
                   wrz_ref,      # VMEM (E+H,2H) bf16  resident
                   win_ref,      # VMEM (E, H)   bf16  resident
                   whn_ref,      # VMEM (H, H)   bf16  resident
                   brz_ref,      # VMEM (1, 2H)  f32
                   bin_ref,      # VMEM (1, H)   f32
                   bhn_ref,      # VMEM (1, H)   f32
                   out_ref,      # VMEM (1, B, H) f32  (block for step t)
                   h_scr,        # VMEM (B, H) f32 scratch  (hidden-state carry)
                   x_scr):       # VMEM (B, E) f32 scratch  (gathered embeddings)
    t = pl.program_id(0)
    B, H = h_scr.shape

    @pl.when(t == 0)
    def _():
        h_scr[...] = h0_ref[...]

    # In-kernel embedding lookup: token ids come from SMEM, rows are sliced out
    # of the VMEM-resident table (B is small & static -> unrolled).
    for b in range(B):
        tok = tok_ref[t, b]
        x_scr[pl.ds(b, 1), :] = emb_ref[pl.ds(tok, 1), :]

    x = x_scr[...]                                # (B, E) f32
    h = h_scr[...]                                # (B, H) f32

    # r/z gates: single fused MXU matmul over [x, h] (bf16 in, f32 accumulate),
    # with the r/z input+hidden biases pre-folded into b_rz.
    xh = jnp.concatenate([x, h], axis=1).astype(jnp.bfloat16)        # (B, E+H)
    rz = jnp.dot(xh, wrz_ref[...], preferred_element_type=jnp.float32) + brz_ref[...]
    r = jax.nn.sigmoid(rz[:, :H])
    z = jax.nn.sigmoid(rz[:, H:])

    # n gate: W_hn h stays separate (it is scaled by r before the add).
    gin = jnp.dot(x.astype(jnp.bfloat16), win_ref[...],
                  preferred_element_type=jnp.float32) + bin_ref[...]
    ghn = jnp.dot(h.astype(jnp.bfloat16), whn_ref[...],
                  preferred_element_type=jnp.float32) + bhn_ref[...]
    n = jnp.tanh(gin + r * ghn)

    h_new = n + z * (h - n)                       # == (1-z)*n + z*h, fewer VALU ops
    h_scr[...] = h_new
    out_ref[0] = h_new


# ----------------------------------------------------------------------------
# One-time parameter preprocessing (kept OUT of the per-step path).
# ----------------------------------------------------------------------------
def prepare_gru_params(params):
    H = params["w_hh"].shape[1]
    w_ih_t = params["w_ih"].T                     # (E, 3H)
    w_hh_t = params["w_hh"].T                     # (H, 3H)
    return {
        "embedding": params["embedding"].astype(jnp.float32),
        # stacked r/z projection: [x, h] @ W_rz  -> (B, 2H)
        "w_rz": jnp.concatenate([w_ih_t[:, :2 * H], w_hh_t[:, :2 * H]],
                                axis=0).astype(jnp.bfloat16),         # (E+H, 2H)
        "w_in": w_ih_t[:, 2 * H:].astype(jnp.bfloat16),               # (E, H)
        "w_hn": w_hh_t[:, 2 * H:].astype(jnp.bfloat16),               # (H, H)
        "b_rz": (params["b_ih"][:2 * H] + params["b_hh"][:2 * H])
                .reshape(1, 2 * H).astype(jnp.float32),
        "b_in": params["b_ih"][2 * H:].reshape(1, H).astype(jnp.float32),
        "b_hn": params["b_hh"][2 * H:].reshape(1, H).astype(jnp.float32),
    }


# ----------------------------------------------------------------------------
# Forward: embeds input and applies the GRU one token at a time (seq_len = 1
# per step), all fused into a single pallas_call.  T == 1 reproduces the
# original single-token forward exactly.
#   tokens : (B, T) int32
#   h0     : (B, H) float32
# Returns (output (B, T, H), h_final (B, H)).
# ----------------------------------------------------------------------------
def generator_forward(tokens, h0, prep):
    B, T = tokens.shape
    V, E = prep["embedding"].shape
    H = prep["w_hn"].shape[1]

    out_tbh = pl.pallas_call(
        gru_seq_kernel,
        out_shape=jax.ShapeDtypeStruct((T, B, H), jnp.float32),
        grid_spec=pltpu.PrefetchScalarGridSpec(
            num_scalar_prefetch=1,                # token ids -> SMEM
            grid=(T,),
            in_specs=[
                pl.BlockSpec((V, E), lambda t, tok: (0, 0)),          # embedding
                pl.BlockSpec((B, H), lambda t, tok: (0, 0)),          # h0
                pl.BlockSpec((E + H, 2 * H), lambda t, tok: (0, 0)),  # W_rz
                pl.BlockSpec((E, H), lambda t, tok: (0, 0)),          # W_in
                pl.BlockSpec((H, H), lambda t, tok: (0, 0)),          # W_hn
                pl.BlockSpec((1, 2 * H), lambda t, tok: (0, 0)),      # b_rz
                pl.BlockSpec((1, H), lambda t, tok: (0, 0)),          # b_in
                pl.BlockSpec((1, H), lambda t, tok: (0, 0)),          # b_hn
            ],
            out_specs=pl.BlockSpec((1, B, H), lambda t, tok: (t, 0, 0)),
            scratch_shapes=[
                pltpu.VMEM((B, H), jnp.float32),   # hidden-state carry
                pltpu.VMEM((B, E), jnp.float32),   # gathered embeddings
            ],
        ),
        compiler_params=pltpu.CompilerParams(
            dimension_semantics=("arbitrary",)),   # sequential: h carries across steps
    )(tokens.T, prep["embedding"], h0,
      prep["w_rz"], prep["w_in"], prep["w_hn"],
      prep["b_rz"], prep["b_in"], prep["b_hn"])

    output = jnp.transpose(out_tbh, (1, 0, 2))     # (B, T, H), batch-first
    h_final = out_tbh[T - 1]                       # (B, H)
    return output, h_final


# TODO(synk): `sample` / `sample_text` are autoregressive sampling drivers over
# the wrapped model's (undefined) output head; they are not a single-kernel
# compute path and are not implemented here.


def init_params(key, vocab_size, embed_dim, hidden_dim):
    k_emb, k_wih, k_whh, k_bih, k_bhh = jax.random.split(key, 5)
    scale = 1.0 / jnp.sqrt(hidden_dim)
    return {
        "embedding": jax.random.normal(k_emb, (vocab_size, embed_dim), jnp.float32) * 0.02,
        "w_ih": jax.random.uniform(k_wih, (3 * hidden_dim, embed_dim), jnp.float32,
                                   -scale, scale),
        "w_hh": jax.random.uniform(k_whh, (3 * hidden_dim, hidden_dim), jnp.float32,
                                   -scale, scale),
        "b_ih": jax.random.uniform(k_bih, (3 * hidden_dim,), jnp.float32, -scale, scale),
        "b_hh": jax.random.uniform(k_bhh, (3 * hidden_dim,), jnp.float32, -scale, scale),
    }


if __name__ == "__main__":
    B = 8            # batch
    T = 8            # number of single-token steps fused into one kernel
    VOCAB = 32       # vocabulary size
    E = 128          # embedding dim
    H = 128          # GRU hidden dim

    key = jax.random.PRNGKey(0)
    k_par, k_tok, k_h = jax.random.split(key, 3)

    params = init_params(k_par, VOCAB, E, H)
    prep = prepare_gru_params(params)            # one-time preprocessing
    tokens = jax.random.randint(k_tok, (B, T), 0, VOCAB, dtype=jnp.int32)
    h_prev = jax.random.normal(k_h, (B, H), jnp.float32)

    output, h_new = generator_forward(tokens, h_prev, prep)
    jax.block_until_ready((output, h_new))

    # Pure-JAX reference (PyTorch gate convention, same bf16 weights / f32 accum).
    w_ih_b = params["w_ih"].astype(jnp.bfloat16)
    w_hh_b = params["w_hh"].astype(jnp.bfloat16)
    h_ref = h_prev
    outs_ref = []
    for t in range(T):
        x = jnp.take(params["embedding"], tokens[:, t], axis=0)          # (B, E)
        gi = jnp.dot(x.astype(jnp.bfloat16), w_ih_b.T,
                     preferred_element_type=jnp.float32) + params["b_ih"]
        gh = jnp.dot(h_ref.astype(jnp.bfloat16), w_hh_b.T,
                     preferred_element_type=jnp.float32) + params["b_hh"]
        i_r, i_z, i_n = gi[:, :H], gi[:, H:2 * H], gi[:, 2 * H:]
        h_r, h_z, h_n = gh[:, :H], gh[:, H:2 * H], gh[:, 2 * H:]
        r = jax.nn.sigmoid(i_r + h_r)
        z = jax.nn.sigmoid(i_z + h_z)
        n = jnp.tanh(i_n + r * h_n)
        h_ref = (1.0 - z) * n + z * h_ref
        outs_ref.append(h_ref)
    out_ref_bth = jnp.stack(outs_ref, axis=1)                            # (B, T, H)

    assert output.shape == (B, T, H)
    assert h_new.shape == (B, H)
    assert jnp.allclose(output, out_ref_bth, atol=1e-3, rtol=1e-3)
    assert jnp.allclose(h_new, h_ref, atol=1e-3, rtol=1e-3)

    print("KERNEL_OK")
</pallas_src>

<mosaic_0001>
module attributes {stable_mosaic.version = 11 : i64} {
  func.func @gru_seq_kernel(%arg0: i32, %arg1: memref<8x8xi32, #tpu.memory_space<smem>>, %arg2: memref<32x128xf32, #tpu.memory_space<vmem>>, %arg3: memref<8x128xf32, #tpu.memory_space<vmem>>, %arg4: memref<256x256xbf16, #tpu.memory_space<vmem>>, %arg5: memref<128x128xbf16, #tpu.memory_space<vmem>>, %arg6: memref<128x128xbf16, #tpu.memory_space<vmem>>, %arg7: memref<1x256xf32, #tpu.memory_space<vmem>>, %arg8: memref<1x128xf32, #tpu.memory_space<vmem>>, %arg9: memref<1x128xf32, #tpu.memory_space<vmem>>, %arg10: memref<1x8x128xf32, #tpu.memory_space<vmem>>, %arg11: memref<8x128xf32, #tpu.memory_space<vmem>>, %arg12: memref<8x128xf32, #tpu.memory_space<vmem>>) attributes {dimension_semantics = [#tpu.dimension_semantics<arbitrary>], iteration_bounds = array<i64: 8>, scalar_prefetch = 1 : i64, scratch_operands = 2 : i64, tpu.core_type = #tpu.core_type<tc>, window_params = [{pipeline_mode = #tpu.pipeline_mode<synchronous>, transform_indices = @transform_0, window_bounds = array<i64: 32, 128>}, {pipeline_mode = #tpu.pipeline_mode<synchronous>, transform_indices = @transform_1, window_bounds = array<i64: 8, 128>}, {pipeline_mode = #tpu.pipeline_mode<synchronous>, transform_indices = @transform_2, window_bounds = array<i64: 256, 256>}, {pipeline_mode = #tpu.pipeline_mode<synchronous>, transform_indices = @transform_3, window_bounds = array<i64: 128, 128>}, {pipeline_mode = #tpu.pipeline_mode<synchronous>, transform_indices = @transform_4, window_bounds = array<i64: 128, 128>}, {pipeline_mode = #tpu.pipeline_mode<synchronous>, transform_indices = @transform_5, window_bounds = array<i64: 1, 256>}, {pipeline_mode = #tpu.pipeline_mode<synchronous>, transform_indices = @transform_6, window_bounds = array<i64: 1, 128>}, {pipeline_mode = #tpu.pipeline_mode<synchronous>, transform_indices = @transform_7, window_bounds = array<i64: 1, 128>}, {transform_indices = @transform_8, window_bounds = array<i64: 1, 8, 128>}]} {
    %c0_i32 = arith.constant 0 : i32
    %0 = arith.cmpi eq, %arg0, %c0_i32 : i32
    %1 = arith.extui %0 : i1 to i32
    %c0_i32_0 = arith.constant 0 : i32
    %2 = arith.cmpi ne, %1, %c0_i32_0 : i32
    scf.if %2 {
      %c0_50 = arith.constant 0 : index
      %c0_51 = arith.constant 0 : index
      %86 = vector.load %arg3[%c0_50, %c0_51] : memref<8x128xf32, #tpu.memory_space<vmem>>, vector<8x128xf32>
      %c0_52 = arith.constant 0 : index
      %c0_53 = arith.constant 0 : index
      %87 = vector.load %arg11[%c0_52, %c0_53] : memref<8x128xf32, #tpu.memory_space<vmem>>, vector<8x128xf32>
      tpu.vector_store %arg11[%c0_52, %c0_53], %86 {strides = array<i32>} : memref<8x128xf32, #tpu.memory_space<vmem>>, vector<8x128xf32>,
    } else {
    }
    %3 = arith.index_cast %arg0 : i32 to index
    %c0 = arith.constant 0 : index
    %4 = memref.load %arg1[%3, %c0] : memref<8x8xi32, #tpu.memory_space<smem>>
    %5 = arith.index_cast %4 : i32 to index
    %c0_1 = arith.constant 0 : index
    %6 = vector.load %arg2[%5, %c0_1] : memref<32x128xf32, #tpu.memory_space<vmem>>, vector<1x128xf32>
    %c0_2 = arith.constant 0 : index
    %c0_3 = arith.constant 0 : index
    %7 = vector.load %arg12[%c0_2, %c0_3] : memref<8x128xf32, #tpu.memory_space<vmem>>, vector<1x128xf32>
    tpu.vector_store %arg12[%c0_2, %c0_3], %6 {strides = array<i32>} : memref<8x128xf32, #tpu.memory_space<vmem>>, vector<1x128xf32>,
    %8 = arith.index_cast %arg0 : i32 to index
    %c1 = arith.constant 1 : index
    %9 = memref.load %arg1[%8, %c1] : memref<8x8xi32, #tpu.memory_space<smem>>
    %10 = arith.index_cast %9 : i32 to index
    %c0_4 = arith.constant 0 : index
    %11 = vector.load %arg2[%10, %c0_4] : memref<32x128xf32, #tpu.memory_space<vmem>>, vector<1x128xf32>
    %c1_5 = arith.constant 1 : index
    %c0_6 = arith.constant 0 : index
    %12 = vector.load %arg12[%c1_5, %c0_6] : memref<8x128xf32, #tpu.memory_space<vmem>>, vector<1x128xf32>
    tpu.vector_store %arg12[%c1_5, %c0_6], %11 {strides = array<i32>} : memref<8x128xf32, #tpu.memory_space<vmem>>, vector<1x128xf32>,
    %13 = arith.index_cast %arg0 : i32 to index
    %c2 = arith.constant 2 : index
    %14 = memref.load %arg1[%13, %c2] : memref<8x8xi32, #tpu.memory_space<smem>>
    %15 = arith.index_cast %14 : i32 to index
    %c0_7 = arith.constant 0 : index
    %16 = vector.load %arg2[%15, %c0_7] : memref<32x128xf32, #tpu.memory_space<vmem>>, vector<1x128xf32>
    %c2_8 = arith.constant 2 : index
    %c0_9 = arith.constant 0 : index
    %17 = vector.load %arg12[%c2_8, %c0_9] : memref<8x128xf32, #tpu.memory_space<vmem>>, vector<1x128xf32>
    tpu.vector_store %arg12[%c2_8, %c0_9], %16 {strides = array<i32>} : memref<8x128xf32, #tpu.memory_space<vmem>>, vector<1x128xf32>,
    %18 = arith.index_cast %arg0 : i32 to index
    %c3 = arith.constant 3 : index
    %19 = memref.load %arg1[%18, %c3] : memref<8x8xi32, #tpu.memory_space<smem>>
    %20 = arith.index_cast %19 : i32 to index
    %c0_10 = arith.constant 0 : index
    %21 = vector.load %arg2[%20, %c0_10] : memref<32x128xf32, #tpu.memory_space<vmem>>, vector<1x128xf32>
    %c3_11 = arith.constant 3 : index
    %c0_12 = arith.constant 0 : index
    %22 = vector.load %arg12[%c3_11, %c0_12] : memref<8x128xf32, #tpu.memory_space<vmem>>, vector<1x128xf32>
    tpu.vector_store %arg12[%c3_11, %c0_12], %21 {strides = array<i32>} : memref<8x128xf32, #tpu.memory_space<vmem>>, vector<1x128xf32>,
    %23 = arith.index_cast %arg0 : i32 to index
    %c4 = arith.constant 4 : index
    %24 = memref.load %arg1[%23, %c4] : memref<8x8xi32, #tpu.memory_space<smem>>
    %25 = arith.index_cast %24 : i32 to index
    %c0_13 = arith.constant 0 : index
    %26 = vector.load %arg2[%25, %c0_13] : memref<32x128xf32, #tpu.memory_space<vmem>>, vector<1x128xf32>
    %c4_14 = arith.constant 4 : index
    %c0_15 = arith.constant 0 : index
    %27 = vector.load %arg12[%c4_14, %c0_15] : memref<8x128xf32, #tpu.memory_space<vmem>>, vector<1x128xf32>
    tpu.vector_store %arg12[%c4_14, %c0_15], %26 {strides = array<i32>} : memref<8x128xf32, #tpu.memory_space<vmem>>, vector<1x128xf32>,
    %28 = arith.index_cast %arg0 : i32 to index
    %c5 = arith.constant 5 : index
    %29 = memref.load %arg1[%28, %c5] : memref<8x8xi32, #tpu.memory_space<smem>>
    %30 = arith.index_cast %29 : i32 to index
    %c0_16 = arith.constant 0 : index
    %31 = vector.load %arg2[%30, %c0_16] : memref<32x128xf32, #tpu.memory_space<vmem>>, vector<1x128xf32>
    %c5_17 = arith.constant 5 : index
    %c0_18 = arith.constant 0 : index
    %32 = vector.load %arg12[%c5_17, %c0_18] : memref<8x128xf32, #tpu.memory_space<vmem>>, vector<1x128xf32>
    tpu.vector_store %arg12[%c5_17, %c0_18], %31 {strides = array<i32>} : memref<8x128xf32, #tpu.memory_space<vmem>>, vector<1x128xf32>,
    %33 = arith.index_cast %arg0 : i32 to index
    %c6 = arith.constant 6 : index
    %34 = memref.load %arg1[%33, %c6] : memref<8x8xi32, #tpu.memory_space<smem>>
    %35 = arith.index_cast %34 : i32 to index
    %c0_19 = arith.constant 0 : index
    %36 = vector.load %arg2[%35, %c0_19] : memref<32x128xf32, #tpu.memory_space<vmem>>, vector<1x128xf32>
    %c6_20 = arith.constant 6 : index
    %c0_21 = arith.constant 0 : index
    %37 = vector.load %arg12[%c6_20, %c0_21] : memref<8x128xf32, #tpu.memory_space<vmem>>, vector<1x128xf32>
    tpu.vector_store %arg12[%c6_20, %c0_21], %36 {strides = array<i32>} : memref<8x128xf32, #tpu.memory_space<vmem>>, vector<1x128xf32>,
    %38 = arith.index_cast %arg0 : i32 to index
    %c7 = arith.constant 7 : index
    %39 = memref.load %arg1[%38, %c7] : memref<8x8xi32, #tpu.memory_space<smem>>
    %40 = arith.index_cast %39 : i32 to index
    %c0_22 = arith.constant 0 : index
    %41 = vector.load %arg2[%40, %c0_22] : memref<32x128xf32, #tpu.memory_space<vmem>>, vector<1x128xf32>
    %c7_23 = arith.constant 7 : index
    %c0_24 = arith.constant 0 : index
    %42 = vector.load %arg12[%c7_23, %c0_24] : memref<8x128xf32, #tpu.memory_space<vmem>>, vector<1x128xf32>
    tpu.vector_store %arg12[%c7_23, %c0_24], %41 {strides = array<i32>} : memref<8x128xf32, #tpu.memory_space<vmem>>, vector<1x128xf32>,
    %c0_25 = arith.constant 0 : index
    %c0_26 = arith.constant 0 : index
    %43 = vector.load %arg12[%c0_25, %c0_26] : memref<8x128xf32, #tpu.memory_space<vmem>>, vector<8x128xf32>
    %c0_27 = arith.constant 0 : index
    %c0_28 = arith.constant 0 : index
    %44 = vector.load %arg11[%c0_27, %c0_28] : memref<8x128xf32, #tpu.memory_space<vmem>>, vector<8x128xf32>
    %45 = tpu.concatenate %43, %44 in 1 : vector<8x128xf32>, vector<8x128xf32> -> vector<8x256xf32>
    %46 = arith.truncf %45 : vector<8x256xf32> to vector<8x256xbf16>
    %c0_29 = arith.constant 0 : index
    %c0_30 = arith.constant 0 : index
    %47 = vector.load %arg4[%c0_29, %c0_30] : memref<256x256xbf16, #tpu.memory_space<vmem>>, vector<256x256xbf16>
    %cst = arith.constant dense<0.000000e+00> : vector<8x256xf32>
    %48 = tpu.matmul %46, %47, %cst {dimension_numbers = #tpu.dot_dimension_numbers<[1], [0], [0], [1], [0, 0, 1, 1], [], []>} : vector<8x256xbf16>, vector<256x256xbf16>, vector<8x256xf32> -> vector<8x256xf32>
    %c0_31 = arith.constant 0 : index
    %c0_32 = arith.constant 0 : index
    %49 = vector.load %arg7[%c0_31, %c0_32] : memref<1x256xf32, #tpu.memory_space<vmem>>, vector<1x256xf32>
    %50 = vector.broadcast %49 : vector<1x256xf32> to vector<8x256xf32>
    %51 = arith.addf %48, %50 : vector<8x256xf32>
    %52 = vector.extract_strided_slice %51 {offsets = [0, 0], sizes = [8, 128], strides = [1, 1]} : vector<8x256xf32> to vector<8x128xf32>
    %53 = arith.negf %52 : vector<8x128xf32>
    %54 = math.exp %53 : vector<8x128xf32>
    %cst_33 = arith.constant 1.000000e+00 : f32
    %55 = vector.broadcast %cst_33 : f32 to vector<8x128xf32>
    %56 = arith.addf %55, %54 : vector<8x128xf32>
    %57 = arith.divf %55, %56 : vector<8x128xf32>
    %58 = vector.extract_strided_slice %51 {offsets = [0, 128], sizes = [8, 128], strides = [1, 1]} : vector<8x256xf32> to vector<8x128xf32>
    %59 = arith.negf %58 : vector<8x128xf32>
    %60 = math.exp %59 : vector<8x128xf32>
    %cst_34 = arith.constant 1.000000e+00 : f32
    %61 = vector.broadcast %cst_34 : f32 to vector<8x128xf32>
    %62 = arith.addf %61, %60 : vector<8x128xf32>
    %63 = arith.divf %61, %62 : vector<8x128xf32>
    %64 = arith.truncf %43 : vector<8x128xf32> to vector<8x128xbf16>
    %c0_35 = arith.constant 0 : index
    %c0_36 = arith.constant 0 : index
    %65 = vector.load %arg5[%c0_35, %c0_36] : memref<128x128xbf16, #tpu.memory_space<vmem>>, vector<128x128xbf16>
    %cst_37 = arith.constant dense<0.000000e+00> : vector<8x128xf32>
    %66 = tpu.matmul %64, %65, %cst_37 {dimension_numbers = #tpu.dot_dimension_numbers<[1], [0], [0], [1], [0, 0, 1, 1], [], []>} : vector<8x128xbf16>, vector<128x128xbf16>, vector<8x128xf32> -> vector<8x128xf32>
    %c0_38 = arith.constant 0 : index
    %c0_39 = arith.constant 0 : index
    %67 = vector.load %arg8[%c0_38, %c0_39] : memref<1x128xf32, #tpu.memory_space<vmem>>, vector<1x128xf32>
    %68 = vector.broadcast %67 : vector<1x128xf32> to vector<8x128xf32>
    %69 = arith.addf %66, %68 : vector<8x128xf32>
    %70 = arith.truncf %44 : vector<8x128xf32> to vector<8x128xbf16>
    %c0_40 = arith.constant 0 : index
    %c0_41 = arith.constant 0 : index
    %71 = vector.load %arg6[%c0_40, %c0_41] : memref<128x128xbf16, #tpu.memory_space<vmem>>, vector<128x128xbf16>
    %cst_42 = arith.constant dense<0.000000e+00> : vector<8x128xf32>
    %72 = tpu.matmul %70, %71, %cst_42 {dimension_numbers = #tpu.dot_dimension_numbers<[1], [0], [0], [1], [0, 0, 1, 1], [], []>} : vector<8x128xbf16>, vector<128x128xbf16>, vector<8x128xf32> -> vector<8x128xf32>
    %c0_43 = arith.constant 0 : index
    %c0_44 = arith.constant 0 : index
    %73 = vector.load %arg9[%c0_43, %c0_44] : memref<1x128xf32, #tpu.memory_space<vmem>>, vector<1x128xf32>
    %74 = vector.broadcast %73 : vector<1x128xf32> to vector<8x128xf32>
    %75 = arith.addf %72, %74 : vector<8x128xf32>
    %76 = arith.mulf %57, %75 : vector<8x128xf32>
    %77 = arith.addf %69, %76 : vector<8x128xf32>
    %78 = math.tanh %77 : vector<8x128xf32>
    %79 = arith.subf %44, %78 : vector<8x128xf32>
    %80 = arith.mulf %63, %79 : vector<8x128xf32>
    %81 = arith.addf %78, %80 : vector<8x128xf32>
    %c0_45 = arith.constant 0 : index
    %c0_46 = arith.constant 0 : index
    %82 = vector.load %arg11[%c0_45, %c0_46] : memref<8x128xf32, #tpu.memory_space<vmem>>, vector<8x128xf32>
    tpu.vector_store %arg11[%c0_45, %c0_46], %81 {strides = array<i32>} : memref<8x128xf32, #tpu.memory_space<vmem>>, vector<8x128xf32>,
    %c0_47 = arith.constant 0 : index
    %c0_48 = arith.constant 0 : index
    %c0_49 = arith.constant 0 : index
    %83 = vector.load %arg10[%c0_47, %c0_48, %c0_49] : memref<1x8x128xf32, #tpu.memory_space<vmem>>, vector<1x8x128xf32>
    %84 = vector.shape_cast %83 : vector<1x8x128xf32> to vector<8x128xf32>
    %85 = vector.shape_cast %81 : vector<8x128xf32> to vector<1x8x128xf32>
    tpu.vector_store %arg10[%c0_47, %c0_48, %c0_49], %85 {strides = array<i32>} : memref<1x8x128xf32, #tpu.memory_space<vmem>>, vector<1x8x128xf32>,
    return
  }
  func.func @transform_0(%arg0: i32, %arg1: memref<8x8xi32, #tpu.memory_space<smem>>) -> (i32, i32) {
    %c0_i32 = arith.constant 0 : i32
    %c0_i32_0 = arith.constant 0 : i32
    %c0_i32_1 = arith.constant 0 : i32
    return %c0_i32, %c0_i32_0 : i32, i32
  }
  func.func @transform_1(%arg0: i32, %arg1: memref<8x8xi32, #tpu.memory_space<smem>>) -> (i32, i32) {
    %c0_i32 = arith.constant 0 : i32
    %c0_i32_0 = arith.constant 0 : i32
    %c0_i32_1 = arith.constant 0 : i32
    return %c0_i32, %c0_i32_0 : i32, i32
  }
  func.func @transform_2(%arg0: i32, %arg1: memref<8x8xi32, #tpu.memory_space<smem>>) -> (i32, i32) {
    %c0_i32 = arith.constant 0 : i32
    %c0_i32_0 = arith.constant 0 : i32
    %c0_i32_1 = arith.constant 0 : i32
    return %c0_i32, %c0_i32_0 : i32, i32
  }
  func.func @transform_3(%arg0: i32, %arg1: memref<8x8xi32, #tpu.memory_space<smem>>) -> (i32, i32) {
    %c0_i32 = arith.constant 0 : i32
    %c0_i32_0 = arith.constant 0 : i32
    %c0_i32_1 = arith.constant 0 : i32
    return %c0_i32, %c0_i32_0 : i32, i32
  }
  func.func @transform_4(%arg0: i32, %arg1: memref<8x8xi32, #tpu.memory_space<smem>>) -> (i32, i32) {
    %c0_i32 = arith.constant 0 : i32
    %c0_i32_0 = arith.constant 0 : i32
    %c0_i32_1 = arith.constant 0 : i32
    return %c0_i32, %c0_i32_0 : i32, i32
  }
  func.func @transform_5(%arg0: i32, %arg1: memref<8x8xi32, #tpu.memory_space<smem>>) -> (i32, i32) {
    %c0_i32 = arith.constant 0 : i32
    %c0_i32_0 = arith.constant 0 : i32
    %c0_i32_1 = arith.constant 0 : i32
    return %c0_i32, %c0_i32_0 : i32, i32
  }
  func.func @transform_6(%arg0: i32, %arg1: memref<8x8xi32, #tpu.memory_space<smem>>) -> (i32, i32) {
    %c0_i32 = arith.constant 0 : i32
    %c0_i32_0 = arith.constant 0 : i32
    %c0_i32_1 = arith.constant 0 : i32
    return %c0_i32, %c0_i32_0 : i32, i32
  }
  func.func @transform_7(%arg0: i32, %arg1: memref<8x8xi32, #tpu.memory_space<smem>>) -> (i32, i32) {
    %c0_i32 = arith.constant 0 : i32
    %c0_i32_0 = arith.constant 0 : i32
    %c0_i32_1 = arith.constant 0 : i32
    return %c0_i32, %c0_i32_0 : i32, i32
  }
  func.func @transform_8(%arg0: i32, %arg1: memref<8x8xi32, #tpu.memory_space<smem>>) -> (i32, i32, i32) {
    %c0_i32 = arith.constant 0 : i32
    %c0_i32_0 = arith.constant 0 : i32
    %c0_i32_1 = arith.constant 0 : i32
    return %arg0, %c0_i32, %c0_i32_0 : i32, i32, i32
  }
}

</mosaic_0001>

<bundles_post_ra>
// kernel: tpu_custom_call.1
= control target key start
LH: loop header
LB: loop body
LE: loop exit
PB: predicated region body
PF: predicated region fallthrough
CT: control target
= control target key end

     0   :  { %s1938_s0 = inlined_call_operand.hbm [shape: s32[8,8], index: 0, kind: input, shape index: {}]   ;;  %s1939_s1 = inlined_call_operand.hbm [shape: f32[32,128], index: 1, kind: input, shape index: {}]   ;;  %s1940_s2 = inlined_call_operand.hbm [shape: f32[8,128], index: 2, kind: input, shape index: {}]   ;;  %s1941_s3 = inlined_call_operand.hbm [shape: bf16[256,256], index: 3, kind: input, shape index: {}]   ;;  %s1942_s4 = inlined_call_operand.hbm [shape: bf16[128,128], index: 4, kind: input, shape index: {}]   ;;  %s1943_s5 = inlined_call_operand.hbm [shape: bf16[128,128], index: 5, kind: input, shape index: {}]   ;;  %s1944_s6 = inlined_call_operand.vmem [shape: f32[1,256], index: 6, kind: input, shape index: {}]   ;;  %s1945_s7 = inlined_call_operand.vmem [shape: f32[1,128], index: 7, kind: input, shape index: {}]   ;;  %s1946_s8 = inlined_call_operand.vmem [shape: f32[1,128], index: 8, kind: input, shape index: {}]   ;;  %s1947_s9 = inlined_call_operand.hbm [shape: f32[8,8,128], index: 9, kind: output, shape index: {}]  }
   0x1   :  { %1957 = sst [smem:[#allocation25_spill]] %s1940_s2  ;;  %s1318_s11 = scalar_lea.hbm %s1938_s0, 128 }
   0x2   :  { %1958 = sst [smem:[#allocation26_spill]] %s1942_s4  ;;  %p1319_p0 = scmp.ne.s32.totalorder %s1938_s0, %s1318_s11 }
   0x3   :  { %p1322_p1 = scmp.lt.u32.totalorder %s1318_s11, %s1938_s0 }
   0x5   :  { %p1324_p2 = pnand %p1322_p1, %p1319_p0 }
   0x7   :  { %1327 = shalt.err (!%p1324_p2)  }
   0x8   :  { %s1546_s16 = smov [#allocation5]  }
   0x9   :  { %15 = dma.hbm_to_smem %s1938_s0, 128, %s1546_s16, [#allocation4] }
   0xa   :  { %1512 = dma.done.wait [#allocation4], 128 }
   0xb   :  { %1513 = vsyncadd [#allocation4], 4294967168 }
   0xc   :  { %17 = sfence }
   0xd   :  { %18 = vsyncpa [#allocation7], 0 }
   0xe   :  { %19 = vsyncpa [#allocation10], 0 }
   0xf   :  { %20 = vsyncpa [#allocation13], 0 }
  0x10   :  { %21 = vsyncpa [#allocation8], 0 }
  0x11   :  { %23 = vsyncpa [#allocation8 + $0x1], 0  ;;  %s1621_s19 = smov 0   ;;  %s1623_s20 = smov 0  }
  0x12   :  { %s1625_s21 = smov 0   ;;  %s1627_s22 = smov 0  }
  0x13 LB: > { %1959 = sst [smem:[#allocation21_spill]] %s1540_s21  ;;  %s1642_s0 = sadd.s32 4294967295, %s1544_s22   ;;  %s1544_s22 = sphi %s1627_s22, %s1983_s22   ;;  %s1540_s21 = sphi %s1625_s21, %s1985_s21   ;;  %s1536_s20 = sphi %s1623_s20, %s1987_s20   ;;  %s1532_s19 = sphi %s1621_s19, %s1986_s19  }
  0x14   : > { %s1017_s23 = sadd.s32 4294967294, %s1544_s22   ;;  %s1646_s24 = sadd.s32 1, %s1544_s22  }
  0x15   : > { %1960 = sst [smem:[#allocation22_spill]] %s1646_s24  ;;  %s204_s25 = sadd.s32 1, %s1540_s21 }
  0x16   : > { %s201_s26 = ssub.s32 %s1544_s22, %s1646_s24  ;;  %p214_p3 = scmp.ne.s32.totalorder %s1540_s21, %s1536_s20 }
  0x17   : > { %p202_p4 = scmp.eq.s32.totalorder %s201_s26, 0  ;;  %p215_p5 = scmp.eq.s32.totalorder %s1642_s0, 7 }
  0x18   : > { %p220_p6 = scmp.ne.s32.totalorder %s1536_s20, %s1532_s19  ;;  %p221_p7 = scmp.eq.s32.totalorder %s1017_s23, 7 }
  0x19   : > { %s1657_s27 = scalar_select %p202_p4, %s1540_s21, %s204_s25  }
  0x1a   : > { %p1659_p8 = por %p215_p5, %p214_p3  ;;  %p1663_p9 = por %p221_p7, %p220_p6 }
  0x1b   : > { %1961 = sst [smem:[#allocation23_spill]] %s1657_s27  ;;  %p1018_p10 = scmp.ge.s32.totalorder %s1544_s22, 1 }
  0x1c   : > { %s1962_s28 = scalar_select %p1659_p8, 1, 0 }
  0x1d   : > { %s1963_s29 = scalar_select %p1663_p9, 1, 0 }
  0x1e   : > { %p228_p11 = scmp.lt.s32.totalorder %s1544_s22, 9  ;;  %p1948_p13 = scmp.eq.s32.totalorder %s1642_s0, 0 }
  0x1f   : > { %1964 = sst [smem:[#allocation24_spill]] %s1963_s29  ;;  %s1547_s10 = smov [#allocation9]  }
  0x20   : > { %p1671_p0 = pnand %p1018_p10, %p228_p11  ;;  %s254_s11 = sshll.u32 %s1547_s10, 4  ;;  %s255_s11 = int_to_ptr.vmem [resolvable:$true] %s254_s11 }
  0x21   : > { %s1548_s12 = smov [#allocation12]   ;;  %s1549_s15 = smov [#allocation6]  }
  0x22   : > { %s1965_s30 = scalar_select %p1671_p0, 1, 0 }
  0x23   : > { %p1169_p1 = pneg %p1671_p0  ;;  %s277_s13 = sshll.u32 %s1548_s12, 4  ;;  %s1683_s13 = int_to_ptr.vmem [resolvable:$true] %s277_s13 }
  0x24   : > { %s1685_s16 = sshll.u32 %s1549_s15, 4  ;;  %s1967_s2 = sld [smem:[#allocation25_spill]]  ;;  %s241_s16 = int_to_ptr.vmem [resolvable:$true] %s1685_s16 }
  0x25   : > { %p1679_p2 = pnand %p1948_p13, %p1169_p1 }
  0x27   : > { %p1695_p4 = pneg %p1679_p2 }
  0x2a   : > { %s1328_s23 = scalar_lea.hbm %s1967_s2, 128 }
  0x2b   : > { %p1329_p3 = scmp.ne.s32.totalorder %s1967_s2, %s1328_s23  ;;  %p1335_p7 = scmp.lt.u32.totalorder %s1328_s23, %s1967_s2 }
  0x2d   : > { %p1331_p5 = pnand %p1695_p4, %p1329_p3 }
  0x2f   : > { %p1332_p6 = pneg %p1331_p5 }
  0x31   : > { %p1337_p10 = pnand %p1335_p7, %p1332_p6 }
  0x33   : > { %1340 = shalt.err (!%p1337_p10)
}
  0x34   : > { %s1341_s17 = scalar_lea.vmem %s255_s11, 128  ;;  %p1349_p13 = scmp.lt.s32.totalorder %s255_s11, %s255_s11 }
  0x35   : > { %p1342_p11 = scmp.ne.s32.totalorder %s255_s11, %s1341_s17  ;;  %p1350_p9 = scmp.lt.s32.totalorder %s1341_s17, %s1341_s17 }
  0x37   : > { %p1344_p1 = pnand %p1342_p11, %p1695_p4  ;;  %p1351_p8 = por %p1350_p9, %p1349_p13 }
  0x39   : > { %p1345_p12 = pneg %p1344_p1 }
  0x3b   : > { %p1352_p0 = pnand %p1351_p8, %p1345_p12 }
  0x3d   : > { %1355 = shalt.err (!%p1352_p0)
}
  0x3e   : > { %1175 = dma.hbm_to_vmem [thread:$0]  (!%p1679_p2), %s1967_s2, 128, %s255_s11, [#allocation10]  }
  0x3f   : > { %s1969_s4 = sld [smem:[#allocation26_spill]] }
  0x45   : > { %s1356_s12 = scalar_lea.hbm %s1969_s4, 1024 }
  0x46   : > { %p1357_p3 = scmp.ne.s32.totalorder %s1969_s4, %s1356_s12  ;;  %p1363_p8 = scmp.lt.u32.totalorder %s1356_s12, %s1969_s4 }
  0x48   : > { %p1359_p5 = pnand %p1357_p3, %p1695_p4 }
  0x4a   : > { %p1360_p9 = pneg %p1359_p5 }
  0x4c   : > { %p1365_p12 = pnand %p1363_p8, %p1360_p9 }
  0x4e   : > { %1368 = shalt.err (!%p1365_p12)
}
  0x4f   : > { %s1369_s11 = scalar_lea.vmem %s1683_s13, 1024  ;;  %p1377_p7 = scmp.lt.s32.totalorder %s1683_s13, %s1683_s13 }
  0x50   : > { %p1370_p13 = scmp.ne.s32.totalorder %s1683_s13, %s1369_s11  ;;  %p1378_p10 = scmp.lt.s32.totalorder %s1369_s11, %s1369_s11 }
  0x52   : > { %p1372_p0 = pnand %p1370_p13, %p1695_p4  ;;  %p1379_p11 = por %p1378_p10, %p1377_p7 }
  0x54   : > { %p1373_p6 = pneg %p1372_p0 }
  0x56   : > { %p1380_p1 = pnand %p1379_p11, %p1373_p6 }
  0x58   : > { %1383 = shalt.err (!%p1380_p1)
}
  0x59   : > { %s1952_s27 = smov 64   ;;  %s1953_s21 = smov 4  }
  0x5a   : > { %1181 = dma.hbm_to_vmem [thread:$0]  (!%p1679_p2), %s1969_s4, 1024, %s1683_s13, [#allocation13], %s1952_s27, %s1952_s27, %s1953_s21  }
  0x5b   : > { %s1384_s12 = scalar_lea.hbm %s1939_s1, 512 }
  0x5c   : > { %p1385_p3 = scmp.ne.s32.totalorder %s1939_s1, %s1384_s12  ;;  %p1391_p8 = scmp.lt.u32.totalorder %s1384_s12, %s1939_s1 }
  0x5e   : > { %p1387_p5 = pnand %p1385_p3, %p1695_p4 }
  0x60   : > { %p1388_p9 = pneg %p1387_p5 }
  0x62   : > { %p1393_p12 = pnand %p1391_p8, %p1388_p9 }
  0x64   : > { %1396 = shalt.err (!%p1393_p12)
}
  0x65   : > { %s1397_s18 = scalar_lea.vmem %s241_s16, 512  ;;  %p1405_p7 = scmp.lt.s32.totalorder %s241_s16, %s241_s16 }
  0x66   : > { %p1398_p13 = scmp.ne.s32.totalorder %s241_s16, %s1397_s18  ;;  %p1406_p10 = scmp.lt.s32.totalorder %s1397_s18, %s1397_s18 }
  0x68   : > { %p1400_p0 = pnand %p1398_p13, %p1695_p4  ;;  %p1407_p11 = por %p1406_p10, %p1405_p7 }
  0x6a   : > { %p1401_p6 = pneg %p1400_p0 }
  0x6c   : > { %p1408_p1 = pnand %p1407_p11, %p1401_p6 }
  0x6e   : > { %1411 = shalt.err (!%p1408_p1)
}
  0x6f   : > { %s1552_s13 = smov 128   ;;  %s1553_s25 = smov 8  }
  0x70   : > { %1172 = dma.hbm_to_vmem [thread:$0]  (!%p1679_p2), %s1939_s1, 512, %s241_s16, [#allocation7], %s1552_s13, %s1552_s13, %s1553_s25  }
  0x71   : > { %s1554_s26 = smov [#allocation11]   ;;  %s1555_s15 = smov [#allocation14]  }
  0x72   : > { %s264_s12 = sshll.u32 %s1554_s26, 4  ;;  %s290_s17 = sshll.u32 %s1555_s15, 4  ;;  %s265_s12 = int_to_ptr.vmem [resolvable:$true] %s264_s12  ;;  %s291_s17 = int_to_ptr.vmem [resolvable:$true] %s290_s17 }
  0x73   : > { %s1412_s18 = scalar_lea.hbm %s1941_s3, 4096 }
  0x74   : > { %p1413_p3 = scmp.ne.s32.totalorder %s1941_s3, %s1412_s18  ;;  %p1419_p8 = scmp.lt.u32.totalorder %s1412_s18, %s1941_s3 }
  0x76   : > { %p1415_p5 = pnand %p1413_p3, %p1695_p4 }
  0x78   : > { %p1416_p9 = pneg %p1415_p5 }
  0x7a   : > { %p1421_p12 = pnand %p1419_p8, %p1416_p9 }
  0x7c   : > { %1424 = shalt.err (!%p1421_p12)
}
  0x7d   : > { %s1425_s16 = scalar_lea.vmem %s265_s12, 4096  ;;  %p1433_p7 = scmp.lt.s32.totalorder %s265_s12, %s265_s12 }
  0x7e   : > { %p1426_p13 = scmp.ne.s32.totalorder %s265_s12, %s1425_s16  ;;  %p1434_p10 = scmp.lt.s32.totalorder %s1425_s16, %s1425_s16 }
  0x80   : > { %p1428_p0 = pnand %p1426_p13, %p1695_p4  ;;  %p1435_p11 = por %p1434_p10, %p1433_p7 }
  0x82   : > { %p1429_p6 = pneg %p1428_p0 }
  0x84   : > { %p1436_p1 = pnand %p1435_p11, %p1429_p6 }
  0x86   : > { %1439 = shalt.err (!%p1436_p1)
}
  0x87   : > { %1178 = dma.hbm_to_vmem [thread:$0]  (!%p1679_p2), %s1941_s3, 4096, %s265_s12, [#allocation10], %s1552_s13, %s1552_s13, %s1553_s25  }
  0x88   : > { %s1440_s21 = scalar_lea.hbm %s1943_s5, 1024 }
  0x89   : > { %p1441_p3 = scmp.ne.s32.totalorder %s1943_s5, %s1440_s21  ;;  %p1447_p8 = scmp.lt.u32.totalorder %s1440_s21, %s1943_s5 }
  0x8b   : > { %p1443_p5 = pnand %p1441_p3, %p1695_p4 }
  0x8d   : > { %p1444_p9 = pneg %p1443_p5 }
  0x8f   : > { %p1449_p12 = pnand %p1447_p8, %p1444_p9 }
  0x91   : > { %1452 = shalt.err (!%p1449_p12)
}
  0x92   : > { %s1453_s11 = scalar_lea.vmem %s291_s17, 1024  ;;  %p1461_p7 = scmp.lt.s32.totalorder %s291_s17, %s291_s17 }
  0x93   : > { %p1454_p13 = scmp.ne.s32.totalorder %s291_s17, %s1453_s11  ;;  %p1462_p10 = scmp.lt.s32.totalorder %s1453_s11, %s1453_s11 }
  0x95   : > { %p1456_p0 = pnand %p1454_p13, %p1695_p4  ;;  %p1463_p11 = por %p1462_p10, %p1461_p7 }
  0x97   : > { %p1457_p6 = pneg %p1456_p0 }
  0x99   : > { %p1464_p1 = pnand %p1463_p11, %p1457_p6 }
  0x9b   : > { %1467 = shalt.err (!%p1464_p1)
}
  0x9c   : > { %s1970_s13 = smov 4   ;;  %s1971_s25 = smov 64  }
  0x9d   : > { %1184 = dma.hbm_to_vmem [thread:$0]  (!%p1679_p2), %s1943_s5, 1024, %s291_s17, [#allocation13], %s1971_s25, %s1971_s25, %s1970_s13  }
  0x9e   : > { %p1972_p3 = scmp.ne.s32.totalorder %s1965_s30, 0 }
  0x9f   : > { %p1973_p4 = scmp.eq.s32.totalorder (!%p1972_p3), %s1642_s0, 0 }
  0xa0   : > { %315 = sbr.rel (%p1972_p3) target bundleno = 524 (0x20c), region = 52 }
  0xa7   : > { %1515 = dma.done.wait (%p1973_p4), [#allocation7], 512   ;;  %p1974_p5 = pmov %p1973_p4 }
  0xa8   : > { %p1975_p9 = pmov %p1973_p4 }
  0xa9   : > { %1517 = vsyncadd (%p1974_p5), [#allocation7], 4294966784 }
  0xaa   : > { %1519 = dma.done.wait (%p1975_p9), [#allocation10], 4224   ;;  %p1976_p8 = pmov %p1973_p4 }
  0xab   : > { %p1977_p12 = pmov %p1973_p4 }
  0xac   : > { %1521 = vsyncadd (%p1976_p8), [#allocation10], 4294963072 }
  0xad   : > { %1523 = dma.done.wait (%p1977_p12), [#allocation13], 2048   ;;  %p1978_p2 = pmov %p1973_p4 }
  0xae   : > { %s357_s30 = sand.u32 1, %s1536_s20   ;;  %p1979_p13 = scmp.ne.s32.totalorder %s1642_s0, 0 }
  0xaf   : > { %1525 = vsyncadd (%p1978_p2), [#allocation13], 4294965248  ;;  %s1812_s14 = sshll.u32 %s357_s30, 3  ;;  %v365_v0 = vld [vmem:[#allocation9] sm:$0xff] (!%p1979_p13) }
  0xb0   : > { %s359_s10 = scalar_lea.vmem [#allocation15], %s1812_s14  ;;  %364 = sbr.rel (%p1979_p13) target bundleno = 183 (0xb7), region = 76  ;;  %366 = vst [vmem:[#allocation2] sm:$0xff] (!%p1979_p13), %v365_v0 }
  0xb7 PF: > { %v1244_v1 = vld [vmem:[#allocation11 + $0x4] ss:$8 sps:$4 sm:$0xff]   ;;  %v1246_v2 = vld [vmem:[#allocation11] ss:$8 sps:$4 sm:$0xff]   ;;  %v1556_v3 = vmov 0.0   ;;  %vm1557_vm0 = vmmov 0  }
  0xb8   : > { %1107 = vmatprep.subr.bf16.mxu1 %v1556_v3  ;;  %1123 = vmatprep.mubr.msk.bf16.mxu1 %vm1557_vm0, %v1556_v3  ;;  %v1247_v4 = vld [vmem:[#allocation11 + $0x14] ss:$8 sps:$4 sm:$0xff]   ;;  %v1249_v5 = vld [vmem:[#allocation11 + $0x10] ss:$8 sps:$4 sm:$0xff]   ;;  %v1250_v6 = vld [vmem:[#allocation11 + $0x24] ss:$8 sps:$4 sm:$0xff]  }
  0xb9   : > { %615 = vmatprep.subr.bf16.mxu0 %v1244_v1  ;;  %s1821_s17 = sshll.u32 %s1642_s0, 7  ;;  %v1252_v7 = vld [vmem:[#allocation11 + $0x20] ss:$8 sps:$4 sm:$0xff]   ;;  %v1253_v8 = vld [vmem:[#allocation11 + $0x34] ss:$8 sps:$4 sm:$0xff]   ;;  %p1980_p6 = scmp.ne.s32.totalorder %s1962_s28, 0 }
  0xba   : > { %616 = vmatpush1.bf16.msra.mxu0 %v1246_v2  ;;  %v1264_v9 = vld [vmem:[#allocation12] sm:$0xff]   ;;  %s372_s16 = sadd.s32 1, %s1821_s17  ;;  %v1255_v10 = vld [vmem:[#allocation11 + $0x30] ss:$8 sps:$4 sm:$0xff]   ;;  %v1268_v12 = vld [vmem:[#allocation12 + $0x8] sm:$0xff]   ;;  %s1826_s0 = sld [smem:[#allocation5 + %s1821_s17]]  ;;  %v445_v2 = vlaneseq }
  0xbb   : > { %617 = vmatprep.subr.bf16.mxu0 %v1247_v4  ;;  %1108 = vmatpush3.bf16.msra.mxu1 %v1264_v9  ;;  %v1256_v11 = vld [vmem:[#allocation11 + $0x44] ss:$8 sps:$4 sm:$0xff]   ;;  %s1828_s4 = sld [smem:[#allocation5 + %s372_s16]]  ;;  %v1258_v13 = vld [vmem:[#allocation11 + $0x40] ss:$8 sps:$4 sm:$0xff]   ;;  %s377_s27 = sadd.s32 2, %s1821_s17 }
  0xbc   : > { %1109 = vmatprep.subr.bf16.mxu1 %v1556_v3  ;;  %v1259_v14 = vld [vmem:[#allocation11 + $0x54] ss:$8 sps:$4 sm:$0xff]   ;;  %s382_s24 = sadd.s32 3, %s1821_s17  ;;  %s387_s29 = sadd.s32 4, %s1821_s17  ;;  %v1261_v16 = vld [vmem:[#allocation11 + $0x50] ss:$8 sps:$4 sm:$0xff]  }
  0xbd   : > { %v1272_v15 = vld [vmem:[#allocation12 + $0x10] sm:$0xff]   ;;  %s392_s21 = sadd.s32 5, %s1821_s17  ;;  %s397_s2 = sadd.s32 6, %s1821_s17  ;;  %v1276_v17 = vld [vmem:[#allocation12 + $0x18] sm:$0xff]   ;;  %v1262_v18 = vld [vmem:[#allocation11 + $0x64] ss:$8 sps:$4 sm:$0xff]  }
  0xbe   : > { %618 = vmatpush1.bf16.msra.mxu0 %v1249_v5  ;;  %s1836_s23 = sld [smem:[#allocation5 + %s377_s27]]  ;;  %s402_s26 = sadd.s32 7, %s1821_s17  ;;  %v1265_v19 = vld [vmem:[#allocation11 + $0x60] ss:$8 sps:$4 sm:$0xff]   ;;  %v1266_v21 = vld [vmem:[#allocation11 + $0x74] ss:$8 sps:$4 sm:$0xff]  }
  0xbf   : > { %619 = vmatprep.subr.bf16.mxu0 %v1250_v6  ;;  %1110 = vmatpush3.bf16.msra.mxu1 %v1268_v12  ;;  %s1839_s15 = sld [smem:[#allocation5 + %s382_s24]]  ;;  %v1280_v20 = vld [vmem:[#allocation12 + $0x20] sm:$0xff]   ;;  %v1269_v22 = vld [vmem:[#allocation11 + $0x70] ss:$8 sps:$4 sm:$0xff]   ;;  %v1284_v24 = vld [vmem:[#allocation12 + $0x28] sm:$0xff]   ;;  %v446_v4 = vshrl.u32 %v445_v2, 7 }
  0xc0   : > { %1111 = vmatprep.subr.bf16.mxu1 %v1556_v3  ;;  %s1841_s11 = sld [smem:[#allocation5 + %s387_s29]]  ;;  %v1270_v23 = vld [vmem:[#allocation11 + $0x84] ss:$8 sps:$4 sm:$0xff]   ;;  %s369_s18 = scalar_lea.vmem [#allocation6], %s1826_s0  ;;  %v1273_v33 = vld [vmem:[#allocation11 + $0x80] ss:$8 sps:$4 sm:$0xff]  }
  0xc1   : > { %s1843_s13 = sld [smem:[#allocation5 + %s392_s21]]  ;;  %v370_v25 = vld [vmem:[%s369_s18] sm:$0x1]  ;;  %s374_s16 = scalar_lea.vmem [#allocation6], %s1828_s4  ;;  %v1288_v34 = vld [vmem:[#allocation12 + $0x30] sm:$0xff]   ;;  %v1292_v38 = vld [vmem:[#allocation12 + $0x38] sm:$0xff]  }
  0xc2   : > { %620 = vmatpush1.bf16.msra.mxu0 %v1252_v7  ;;  %s1845_s25 = sld [smem:[#allocation5 + %s397_s2]]  ;;  %371 = vst [vmem:[#allocation3] sm:$0x1] %v370_v25  ;;  %v375_v26 = vld [vmem:[%s374_s16] sm:$0x1]  ;;  %v1296_v44 = vld [vmem:[#allocation14] sm:$0xff]   ;;  %s1892_s16 = scalar_lea.hbm %s1947_s9, %s1821_s17 }
  0xc3   : > { %621 = vmatprep.subr.bf16.mxu0 %v1253_v8  ;;  %1112 = vmatpush3.bf16.msra.mxu1 %v1272_v15  ;;  %s1847_s12 = sld [smem:[#allocation5 + %s402_s26]]  ;;  %376 = vst [vmem:[#allocation3 + $0x1] sm:$0x1] %v375_v26  ;;  %v1274_v35 = vld [vmem:[#allocation11 + $0x94] ss:$8 sps:$4 sm:$0xff]   ;;  %v1861_v37 = vld [vmem:[#allocation2] sm:$0xff] }
  0xc4   : > { %1113 = vmatprep.subr.bf16.mxu1 %v1556_v3  ;;  %s379_s27 = scalar_lea.vmem [#allocation6], %s1836_s23  ;;  %v1277_v36 = vld [vmem:[#allocation11 + $0x90] ss:$8 sps:$4 sm:$0xff]   ;;  %v410_v39 = vpack.c.bf16 %v1861_v37, %v1861_v37  ;;  %v1278_v40 = vld [vmem:[#allocation11 + $0xa4] ss:$8 sps:$4 sm:$0xff]   ;;  %v447_v5 = vsub.s32 0, %v446_v4 }
  0xc5   : > { %v380_v27 = vld [vmem:[%s379_s27] sm:$0x1]  ;;  %s384_s24 = scalar_lea.vmem [#allocation6], %s1839_s15  ;;  %v1282_v45 = vld [vmem:[#allocation11 + $0xb4] ss:$8 sps:$4 sm:$0xff]   ;;  %v1304_v56 = vld [vmem:[#allocation14 + $0x20] sm:$0xff]  }
  0xc6   : > { %622 = vmatpush1.bf16.msra.mxu0 %v1255_v10  ;;  %v385_v28 = vld [vmem:[%s384_s24] sm:$0x1]  ;;  %381 = vst [vmem:[#allocation3 + $0x2] sm:$0x1] %v380_v27  ;;  %s389_s29 = scalar_lea.vmem [#allocation6], %s1841_s11  ;;  %647 = vmatprep.mubr.bf16.mxu0 %v410_v39  ;;  %v1302_v50 = vld [vmem:[#allocation14 + $0x10] sm:$0xff]  }
  0xc7   : > { %623 = vmatprep.subr.bf16.mxu0 %v1256_v11  ;;  %1114 = vmatpush3.bf16.msra.mxu1 %v1276_v17  ;;  %386 = vst [vmem:[#allocation3 + $0x3] sm:$0x1] %v385_v28  ;;  %v390_v29 = vld [vmem:[%s389_s29] sm:$0x1]  ;;  %s394_s0 = scalar_lea.vmem [#allocation6], %s1843_s13  ;;  %v1303_v53 = vld [vmem:[#allocation14 + $0x18] sm:$0xff]  }
  0xc8   : > { %1115 = vmatprep.subr.bf16.mxu1 %v1556_v3  ;;  %v395_v30 = vld [vmem:[%s394_s0] sm:$0x1]  ;;  %s399_s21 = scalar_lea.vmem [#allocation6], %s1845_s25  ;;  %391 = vst [vmem:[#allocation3 + $0x4] sm:$0x1] %v390_v29  ;;  %v1306_v60 = vld [vmem:[#allocation14 + $0x30] sm:$0xff]  }
  0xc9   : > { %v400_v31 = vld [vmem:[%s399_s21] sm:$0x1]  ;;  %396 = vst [vmem:[#allocation3 + $0x5] sm:$0x1] %v395_v30  ;;  %s404_s2 = scalar_lea.vmem [#allocation6], %s1847_s12  ;;  %v1307_v61 = vld [vmem:[#allocation14 + $0x38] sm:$0xff]  }
  0xca   : > { %624 = vmatpush1.bf16.msra.mxu0 %v1258_v13  ;;  %401 = vst [vmem:[#allocation3 + $0x6] sm:$0x1] %v400_v31  ;;  %v405_v32 = vld [vmem:[%s404_s2] sm:$0x1]  ;;  %v1285_v46 = vld [vmem:[#allocation11 + $0xb0] ss:$8 sps:$4 sm:$0xff]  }
  0xcb   : > { %625 = vmatprep.subr.bf16.mxu0 %v1259_v14  ;;  %1116 = vmatpush3.bf16.msra.mxu1 %v1280_v20  ;;  %406 = vst [vmem:[#allocation3 + $0x7] sm:$0x1] %v405_v32  ;;  %v1281_v41 = vld [vmem:[#allocation11 + $0xa0] ss:$8 sps:$4 sm:$0xff]   ;;  %v1286_v48 = vld [vmem:[#allocation11 + $0xc4] ss:$8 sps:$4 sm:$0xff]  }
  0xcc   : > { %1117 = vmatprep.subr.bf16.mxu1 %v1556_v3  ;;  %v1300_v47 = vld [vmem:[#allocation14 + $0x8] sm:$0xff]   ;;  %v1290_v51 = vld [vmem:[#allocation11 + $0xd4] ss:$8 sps:$4 sm:$0xff]   ;;  %v1293_v52 = vld [vmem:[#allocation11 + $0xd0] ss:$8 sps:$4 sm:$0xff]   ;;  %v451_v10 = vsub.s32 1, %v446_v4 }
  0xcd   : > { %v1289_v49 = vld [vmem:[#allocation11 + $0xc0] ss:$8 sps:$4 sm:$0xff]   ;;  %v1294_v54 = vld [vmem:[#allocation11 + $0xe4] ss:$8 sps:$4 sm:$0xff]   ;;  %v1298_v57 = vld [vmem:[#allocation11 + $0xf4] ss:$8 sps:$4 sm:$0xff]  }
  0xce   : > { %626 = vmatpush1.bf16.msra.mxu0 %v1261_v16  ;;  %v1297_v55 = vld [vmem:[#allocation11 + $0xe0] ss:$8 sps:$4 sm:$0xff]   ;;  %v1301_v58 = vld [vmem:[#allocation11 + $0xf0] ss:$8 sps:$4 sm:$0xff]   ;;  %s912_s25 = sshll.u32 %s359_s10, 4  ;;  %s899_s27 = scalar_lea.sflag [#allocation8], %s357_s30  ;;  %s1894_s25 = int_to_ptr.vmem [resolvable:$true] %s912_s25 }
  0xcf   : > { %627 = vmatprep.subr.bf16.mxu0 %v1262_v18  ;;  %1118 = vmatpush3.bf16.msra.mxu1 %v1284_v24  ;;  %v1305_v59 = vld [vmem:[#allocation14 + $0x28] sm:$0xff]   ;;  %s1468_s24 = scalar_lea.vmem %s1894_s25, 128  ;;  %s1558_s29 = smov [#allocation15]  }
  0xd0   : > { %1119 = vmatprep.subr.bf16.mxu1 %v1556_v3  ;;  %v443_v6 = vld [vmem:[%s1944_s6] sm:$0x3]  ;;  %p1469_p0 = scmp.ne.s32.totalorder %s1894_s25, %s1468_s24  ;;  %s1472_s0 = sshll.u32 %s1558_s29, 4  ;;  %s1473_s0 = int_to_ptr.vmem [resolvable:$false] %s1472_s0 }
  0xd1   : > { %v448_v7 = vrot.slane %v443_v6, %v447_v5  ;;  %v452_v14 = vrot.slane %v443_v6, %v451_v10  ;;  %v1067_v25 = vld [vmem:[%s1945_s7] ss:$0 sm:$0xff]  ;;  %s1474_s17 = scalar_lea.vmem %s1473_s0, 256  ;;  %p1475_p11 = scmp.lt.s32.totalorder %s1894_s25, %s1473_s0 }
  0xd2   : > { %628 = vmatpush1.bf16.msra.mxu0 %v1265_v19  ;;  %v407_v42 = vld [vmem:[#allocation3] sm:$0xff]  ;;  %p1470_p7 = pnand %p1469_p0, %p1980_p6  ;;  %p1476_p1 = scmp.lt.s32.totalorder %s1474_s17, %s1468_s24 }
  0xd3   : > { %629 = vmatprep.subr.bf16.mxu0 %v1266_v21  ;;  %1120 = vmatpush3.bf16.msra.mxu1 %v1288_v34  ;;  %v409_v43 = vpack.c.bf16 %v407_v42, %v407_v42 }
  0xd4   : > { %1121 = vmatprep.subr.bf16.mxu1 %v1556_v3  ;;  %p1471_p10 = pneg %p1470_p7  ;;  %p1477_p3 = por %p1476_p1, %p1475_p11 }
  0xd6   : > { %630 = vmatpush1.bf16.msra.mxu0 %v1269_v22  ;;  %p1478_p4 = pnand %p1477_p3, %p1471_p10 }
  0xd7   : > { %631 = vmatprep.subr.bf16.mxu0 %v1270_v23  ;;  %1122 = vmatpush3.bf16.msra.mxu1 %v1292_v38  ;;  %v1076_v23 = vld [vmem:[%s1946_s8] ss:$0 sm:$0xff] }
  0xd8   : > { %1127 = vmatprep.subr.bf16.mxu1 %v1556_v3 }
  0xda   : > { %632 = vmatpush1.bf16.msra.mxu0 %v1273_v33  ;;  %1124 = vmatmul.mubr.bf16.vlgmr.msra.gmra.mrb[0].mxu1 %v409_v43 }
  0xdb   : > { %633 = vmatprep.subr.bf16.mxu0 %v1274_v35  ;;  %1128 = vmatpush3.bf16.msra.mxu1 %v1296_v44 }
  0xdc   : > { %1129 = vmatprep.subr.bf16.mxu1 %v1556_v3  ;;  %1143 = vmatprep.mubr.msk.bf16.mxu1 %vm1557_vm0, %v1556_v3 }
  0xde   : > { %634 = vmatpush1.bf16.msra.mxu0 %v1277_v36 }
  0xdf   : > { %635 = vmatprep.subr.bf16.mxu0 %v1278_v40  ;;  %1130 = vmatpush3.bf16.msra.mxu1 %v1300_v47 }
  0xe0   : > { %1131 = vmatprep.subr.bf16.mxu1 %v1556_v3 }
  0xe2   : > { %636 = vmatpush1.bf16.msra.mxu0 %v1281_v41 }
  0xe3   : > { %637 = vmatprep.subr.bf16.mxu0 %v1282_v45  ;;  %1132 = vmatpush3.bf16.msra.mxu1 %v1302_v50 }
  0xe4   : > { %1133 = vmatprep.subr.bf16.mxu1 %v1556_v3 }
  0xe6   : > { %638 = vmatpush1.bf16.msra.mxu0 %v1285_v46 }
  0xe7   : > { %639 = vmatprep.subr.bf16.mxu0 %v1286_v48  ;;  %1134 = vmatpush3.bf16.msra.mxu1 %v1303_v53 }
  0xe8   : > { %1135 = vmatprep.subr.bf16.mxu1 %v1556_v3 }
  0xea   : > { %640 = vmatpush1.bf16.msra.mxu0 %v1289_v49 }
  0xeb   : > { %641 = vmatprep.subr.bf16.mxu0 %v1290_v51  ;;  %1136 = vmatpush3.bf16.msra.mxu1 %v1304_v56 }
  0xec   : > { %1137 = vmatprep.subr.bf16.mxu1 %v1556_v3 }
  0xee   : > { %642 = vmatpush1.bf16.msra.mxu0 %v1293_v52 }
  0xef   : > { %643 = vmatprep.subr.bf16.mxu0 %v1294_v54  ;;  %1138 = vmatpush3.bf16.msra.mxu1 %v1305_v59 }
  0xf0   : > { %1139 = vmatprep.subr.bf16.mxu1 %v1556_v3 }
  0xf2   : > { %644 = vmatpush1.bf16.msra.mxu0 %v1297_v55 }
  0xf3   : > { %645 = vmatprep.subr.bf16.mxu0 %v1298_v57  ;;  %1140 = vmatpush3.bf16.msra.mxu1 %v1306_v60 }
  0xf4   : > { %1141 = vmatprep.subr.bf16.mxu1 %v1556_v3 }
  0xf6   : > { %646 = vmatpush1.bf16.msra.mxu0 %v1301_v58 }
  0xf7   : > { %1142 = vmatpush3.bf16.msra.mxu1 %v1307_v61 }
  0xf9   : > { %648 = vmatmul.mubr.bf16.vlgmr.msra.gmra.mrb[0].mxu0 %v409_v43 }
  0xfa   : > { %1144 = vmatmul.mubr.bf16.vlgmr.msra.gmra.mrb[4].mxu1 %v410_v39 }
 0x1ad   : > { %v773_v62 = vpop.f32.mrb[0].mxu1 }
 0x1ae   : > { %v1125_v63 = vpop.f32.mrb[1].mxu1  ;;  %v774_v28 = vadd.f32 %v1067_v25, %v773_v62 }
 0x1af   : > { %v776_v0 = vpop.f32.mrb[2].mxu1 }
 0x1b0   : > { %v1126_v1 = vpop.f32.mrb[3].mxu1 }
 0x1cc   : > { %v649_v8 = vpop.f32.mrb[0].mxu0 }
 0x1cd   : > { %v650_v9 = vadd.f32 %v649_v8, %v448_v7  ;;  %v651_v11 = vpop.f32.mrb[1].mxu0  ;;  %v884_v15 = vpop.f32.mrb[4].mxu1 }
 0x1ce   : > { %v653_v12 = vpop.f32.mrb[2].mxu0  ;;  %v652_v16 = vadd.f32 %v651_v11, %v452_v14  ;;  %v1145_v17 = vpop.f32.mrb[5].mxu1  ;;  %v885_v24 = vadd.f32 %v1076_v23, %v884_v15 }
 0x1cf   : > { %v1065_v3 = vmul.f32 -1.442695, %v650_v9  ;;  %v654_v13 = vpop.f32.mrb[3].mxu0  ;;  %v887_v18 = vpop.f32.mrb[6].mxu1 }
 0x1d0   : > { %v1146_v19 = vpop.f32.mrb[7].mxu1  ;;  %v1066_v20 = vmul.f32 -1.442695, %v652_v16 }
 0x1d1   : > { %1308 = vpow2.f32 %v1065_v3 }
 0x1d2   : > { %1310 = vpow2.f32 %v1066_v20 }
 0x1db   : > { %v1309_v21 = vpop.eup %1308 }
 0x1dc   : > { %v659_v22 = vadd.f32 1.0, %v1309_v21  ;;  %v1311_v26 = vpop.eup %1310 }
 0x1dd   : > { %v665_v30 = vadd.f32 1.0, %v1311_v26 }
 0x1de   : > { %1312 = vrcp.f32 %v659_v22 }
 0x1e8   : > { %v1313_v27 = vpop.eup %1312 }
 0x1e9   : > { %v890_v29 = vmul.f32 %v1313_v27, %v885_v24 }
 0x1eb   : > { %v891_v31 = vadd.f32 %v890_v29, %v774_v28 }
 0x1ed   : > { %1314 = vtanh.f32 %v891_v31 }
 0x1ee   : > { %1316 = vrcp.f32 %v665_v30 }
 0x1f7   : > { %v1315_v32 = vpop.eup %1314 }
 0x1f8   : > { %v893_v33 = vsub.f32 %v1861_v37, %v1315_v32  ;;  %v1317_v34 = vpop.eup %1316 }
 0x1fa   : > { %v894_v35 = vmul.f32 %v1317_v34, %v893_v33 }
 0x1fc   : > { %v895_v36 = vadd.f32 %v1315_v32, %v894_v35 }
 0x1fe   : > { %896 = vst [vmem:[#allocation2] sm:$0xff] %v895_v36  ;;  %897 = vst [vmem:[%s359_s10] sm:$0xff] %v895_v36 }
 0x1ff   : > { %1481 = shalt.err (!%p1478_p4)
}
 0x200   : > { %s1482_s30 = scalar_lea.hbm %s1892_s16, 128  ;;  %s1486_s21 = scalar_lea.hbm %s1947_s9, 1024 }
 0x201   : > { %p1483_p5 = scmp.ne.s32.totalorder %s1892_s16, %s1482_s30  ;;  %p1487_p12 = scmp.lt.u32.totalorder %s1892_s16, %s1947_s9 }
 0x202   : > { %p1488_p2 = scmp.lt.u32.totalorder %s1486_s21, %s1482_s30  ;;  %p1490_p0 = scmp.lt.u32.totalorder %s1482_s30, %s1892_s16 }
 0x203   : > { %p1484_p9 = pnand %p1483_p5, %p1980_p6 }
 0x204   : > { %p1489_p13 = por %p1488_p2, %p1487_p12 }
 0x205   : > { %p1485_p8 = pneg %p1484_p9 }
 0x206   : > { %p1491_p7 = por %p1490_p0, %p1489_p13 }
 0x208   : > { %p1492_p10 = pnand %p1491_p7, %p1485_p8 }
 0x20a   : > { %1495 = shalt.err (!%p1492_p10)
}
 0x20b   : > { %1167 = dma.vmem_to_hbm [thread:$0]  (%p1980_p6), %s1894_s25, 128, %s1892_s16, %s899_s27  }
 0x20c PF: > { %s1981_s23 = sld [smem:[#allocation24_spill]]  ;;  %p1199_p11 = scmp.ge.s32.totalorder %s1544_s22, 2 }
 0x20d   : > { %s924_s26 = sand.u32 1, %s1532_s19  }
 0x20e   : > { %s925_s15 = scalar_lea.sflag [#allocation8], %s924_s26 }
 0x212   : > { %p1982_p1 = scmp.ne.s32.totalorder %s1981_s23, 0 }
 0x214   : > { %p1186_p3 = pnand %p1199_p11, %p1982_p1 }
 0x216   : > { %1527 = dma.done.wait (!%p1186_p3), %s925_s15, 128  }
 0x217   : > { %1529 = vsyncadd (!%p1186_p3), %s925_s15, 4294967168  ;;  %s1983_s22 = sld [smem:[#allocation22_spill]]  ;;  %s1984_s11 = sld [smem:[#allocation21_spill]] }
 0x218   : > { %s1985_s21 = sld [smem:[#allocation23_spill]]  ;;  %s1986_s19 = smov %s1536_s20 }
 0x21d   : > { %p26_p4 = scmp.ge.s32.totalorder %s1983_s22, 10   ;;  %s1987_s20 = smov %s1984_s11 }
 0x21f   :  { %28 = sbr.rel (!%p26_p4) target bundleno = 19 (0x13), region = 117 }
 0x226   :  { %930 = vsyncpa [#allocation7], 1 }
 0x227   :  { %932 = vsyncpa [#allocation7 + $0x1], 1 }
 0x228   :  { %933 = vsyncpa [#allocation10], 1 }
 0x229   :  { %934 = vsyncpa [#allocation13], 1 }
 0x22a   :  { %935 = vsyncpa [#allocation8], 1 }
 0x22b   :  { %937 = vsyncpa [#allocation8 + $0x1], 1 }

</bundles_post_ra>
